<compile_context>
chip_gen: v6e
topology: v6e:2x2x1
jax: 0.10.0
libtpu: 0.0.40
codegen_flags: <defaults>
</compile_context>

<pallas_src>
import jax
import jax.numpy as jnp
from jax.experimental import pallas as pl
from jax.experimental.pallas import tpu as pltpu

_LANE = 128        # class dim padded to one full lane width
_SUBLANE = 8       # batch dim padded to a sublane multiple
_MAX_ROW_TILE = 512


def parent_atten_kernel(x_ref, wgt_ref, wvt_ref, bv_ref, out_ref):
    # x:   (TB, 3H)  concat([ht, ct, pt], axis=1), zero-padded rows allowed
    # wgt: (3H, H)   = Wg^T   (prepared once)
    # wvt: (H, CP)   = Wv^T zero-padded to CP = 128 columns
    # bv:  (1, CP)   bias, padded columns hold -1e30
    # out: (TB, CP)  lane-dense log-softmax (padded rows/cols discarded by caller)
    g = jnp.tanh(jnp.dot(x_ref[...], wgt_ref[...],
                         preferred_element_type=jnp.float32))            # (TB, H)
    logits = jnp.dot(g, wvt_ref[...],
                     preferred_element_type=jnp.float32) + bv_ref[...]   # (TB, CP)

    # log_softmax over the lane-dense last dim; padded columns are -1e30, so
    # exp underflows to exactly 0 and the normalizer only sees real C columns.
    m = jnp.max(logits, axis=-1, keepdims=True)
    shifted = logits - m
    lse = jnp.log(jnp.sum(jnp.exp(shifted), axis=-1, keepdims=True))
    out_ref[...] = (shifted - lse).astype(out_ref.dtype)


def prepare_params(wg, wv, bv, c_pad=_LANE):
    """One-time weight preparation (outside the hot path): transpose + lane-pad."""
    H = wg.shape[0]
    C = wv.shape[0]
    assert C <= c_pad
    wgt = jnp.asarray(wg, jnp.float32).T                                   # (3H, H)
    wvt = jnp.zeros((H, c_pad), jnp.float32).at[:, :C].set(
        jnp.asarray(wv, jnp.float32).T)                                    # (H, CP)
    bvp = jnp.full((1, c_pad), -1e30, jnp.float32).at[0, :C].set(
        jnp.asarray(bv, jnp.float32))                                      # (1, CP)
    return {"wgt": wgt, "wvt": wvt, "bv": bvp, "H": H, "C": C}


def _parent_atten_call(x, params):
    """x: (B, 3H) -> (B, C) log-probs via a row-tiled single-launch kernel."""
    B, K3 = x.shape
    CP = params["wvt"].shape[1]
    H = params["wgt"].shape[1]

    # Sublane-align the batch, then pick a row tile that divides the padded batch.
    bp = ((B + _SUBLANE - 1) // _SUBLANE) * _SUBLANE
    tb = min(bp, _MAX_ROW_TILE)
    bp = pl.cdiv(bp, tb) * tb
    if bp != B:
        x = jnp.pad(x, ((0, bp - B), (0, 0)))          # zero rows -> valid (discarded) log-softmax

    grid = (bp // tb,)
    ypad = pl.pallas_call(
        parent_atten_kernel,
        out_shape=jax.ShapeDtypeStruct((bp, CP), jnp.float32),
        grid=grid,
        in_specs=[
            pl.BlockSpec((tb, K3), lambda i: (i, 0)),   # activations: streamed per row tile
            pl.BlockSpec((K3, H), lambda i: (0, 0)),    # Wg^T: resident across the grid
            pl.BlockSpec((H, CP), lambda i: (0, 0)),    # Wv^T (lane-padded): resident
            pl.BlockSpec((1, CP), lambda i: (0, 0)),    # bias (lane-padded): resident
        ],
        out_specs=pl.BlockSpec((tb, CP), lambda i: (i, 0)),
        compiler_params=pltpu.CompilerParams(
            dimension_semantics=("parallel",)),
    )(x, params["wgt"], params["wvt"], params["bv"])
    return ypad[:B, :params["C"]]


def parent_atten_forward(ht, ct, pt, params):
    """Module-equivalent forward: ht/ct/pt have H elements; returns (1, C) log-probs."""
    x = jnp.concatenate(
        [ht.reshape(1, -1), ct.reshape(1, -1), pt.reshape(1, -1)], axis=1)  # (1, 3H)
    return _parent_atten_call(x, params)


def parent_atten_forward_batched(ht, ct, pt, params):
    """Batched variant: ht/ct/pt are (B, H); returns (B, C) log-probs.
    Same kernel body; B rows share one launch and one weight DMA."""
    x = jnp.concatenate([ht, ct, pt], axis=1)                               # (B, 3H)
    return _parent_atten_call(x, params)


def _reference(ht, ct, pt, wg, wv, bv):
    x = jnp.concatenate(
        [ht.reshape(1, -1), ct.reshape(1, -1), pt.reshape(1, -1)], axis=1)
    return jax.nn.log_softmax(jnp.tanh(x @ wg.T) @ wv.T + bv, axis=1)


if __name__ == "__main__":
    hidden_dim = 32
    context_window = 8

    key = jax.random.PRNGKey(0)
    k1, k2, k3, k4, k5, k6, k7, k8 = jax.random.split(key, 8)

    # deterministic "module parameters" (shapes follow nn.Linear conventions)
    wg = jax.random.normal(k4, (hidden_dim, 3 * hidden_dim), jnp.float32) * 0.1  # Wg_linear.weight
    wv = jax.random.normal(k5, (context_window, hidden_dim), jnp.float32) * 0.1  # Wv_linear.weight
    bv = jax.random.normal(k6, (context_window,), jnp.float32) * 0.1             # Wv_linear.bias

    params = prepare_params(wg, wv, bv)   # one-time prep, outside the hot path

    # module-style single call (B = 1, padded to one sublane block inside the wrapper)
    ht = jax.random.normal(k1, (hidden_dim,), jnp.float32)
    ct = jax.random.normal(k2, (hidden_dim,), jnp.float32)
    pt = jax.random.normal(k3, (hidden_dim,), jnp.float32)

    yt = jax.block_until_ready(parent_atten_forward(ht, ct, pt, params))
    ref = _reference(ht, ct, pt, wg, wv, bv)
    assert yt.shape == (1, context_window)
    assert jnp.allclose(yt, ref, atol=1e-5, rtol=1e-5), (yt, ref)

    # batched path: 8 independent (ht, ct, pt) triples through a single launch
    B = 8
    hb = jax.random.normal(k7, (3, B, hidden_dim), jnp.float32)
    yb = jax.block_until_ready(
        parent_atten_forward_batched(hb[0], hb[1], hb[2], params))
    xb = jnp.concatenate([hb[0], hb[1], hb[2]], axis=1)
    refb = jax.nn.log_softmax(jnp.tanh(xb @ wg.T) @ wv.T + bv, axis=1)
    assert yb.shape == (B, context_window)
    assert jnp.allclose(yb, refb, atol=1e-5, rtol=1e-5), (yb, refb)

    # ragged batch (exercises sublane padding of the row dim)
    B2 = 20
    hb2 = jax.random.normal(k8, (3, B2, hidden_dim), jnp.float32)
    yb2 = jax.block_until_ready(
        parent_atten_forward_batched(hb2[0], hb2[1], hb2[2], params))
    xb2 = jnp.concatenate([hb2[0], hb2[1], hb2[2]], axis=1)
    refb2 = jax.nn.log_softmax(jnp.tanh(xb2 @ wg.T) @ wv.T + bv, axis=1)
    assert yb2.shape == (B2, context_window)
    assert jnp.allclose(yb2, refb2, atol=1e-5, rtol=1e-5), (yb2, refb2)

    print("KERNEL_OK")
</pallas_src>

<mosaic_0001>
module attributes {stable_mosaic.version = 11 : i64} {
  func.func @parent_atten_kernel(%arg0: i32, %arg1: memref<8x96xf32, #tpu.memory_space<vmem>>, %arg2: memref<96x32xf32, #tpu.memory_space<vmem>>, %arg3: memref<32x128xf32, #tpu.memory_space<vmem>>, %arg4: memref<1x128xf32, #tpu.memory_space<vmem>>, %arg5: memref<8x128xf32, #tpu.memory_space<vmem>>) attributes {dimension_semantics = [#tpu.dimension_semantics<parallel>], iteration_bounds = array<i64: 1>, scalar_prefetch = 0 : i64, scratch_operands = 0 : i64, tpu.core_type = #tpu.core_type<tc>, window_params = [{transform_indices = @transform_0, window_bounds = array<i64: 8, 96>}, {pipeline_mode = #tpu.pipeline_mode<synchronous>, transform_indices = @transform_1, window_bounds = array<i64: 96, 32>}, {pipeline_mode = #tpu.pipeline_mode<synchronous>, transform_indices = @transform_2, window_bounds = array<i64: 32, 128>}, {pipeline_mode = #tpu.pipeline_mode<synchronous>, transform_indices = @transform_3, window_bounds = array<i64: 1, 128>}, {transform_indices = @transform_4, window_bounds = array<i64: 8, 128>}]} {
    %c0 = arith.constant 0 : index
    %c0_0 = arith.constant 0 : index
    %0 = vector.load %arg1[%c0, %c0_0] : memref<8x96xf32, #tpu.memory_space<vmem>>, vector<8x96xf32>
    %c0_1 = arith.constant 0 : index
    %c0_2 = arith.constant 0 : index
    %1 = vector.load %arg2[%c0_1, %c0_2] : memref<96x32xf32, #tpu.memory_space<vmem>>, vector<96x32xf32>
    %cst = arith.constant dense<0.000000e+00> : vector<8x32xf32>
    %2 = tpu.matmul %0, %1, %cst {dimension_numbers = #tpu.dot_dimension_numbers<[1], [0], [0], [1], [0, 0, 1, 1], [], []>} : vector<8x96xf32>, vector<96x32xf32>, vector<8x32xf32> -> vector<8x32xf32>
    %3 = math.tanh %2 : vector<8x32xf32>
    %c0_3 = arith.constant 0 : index
    %c0_4 = arith.constant 0 : index
    %4 = vector.load %arg3[%c0_3, %c0_4] : memref<32x128xf32, #tpu.memory_space<vmem>>, vector<32x128xf32>
    %cst_5 = arith.constant dense<0.000000e+00> : vector<8x128xf32>
    %5 = tpu.matmul %3, %4, %cst_5 {dimension_numbers = #tpu.dot_dimension_numbers<[1], [0], [0], [1], [0, 0, 1, 1], [], []>} : vector<8x32xf32>, vector<32x128xf32>, vector<8x128xf32> -> vector<8x128xf32>
    %c0_6 = arith.constant 0 : index
    %c0_7 = arith.constant 0 : index
    %6 = vector.load %arg4[%c0_6, %c0_7] : memref<1x128xf32, #tpu.memory_space<vmem>>, vector<1x128xf32>
    %7 = vector.broadcast %6 : vector<1x128xf32> to vector<8x128xf32>
    %8 = arith.addf %5, %7 : vector<8x128xf32>
    %cst_8 = arith.constant dense<0xFF800000> : vector<8xf32>
    %9 = vector.multi_reduction <maximumf>, %8, %cst_8 [1] : vector<8x128xf32> to vector<8xf32>
    %10 = vector.shape_cast %9 : vector<8xf32> to vector<8x1xf32>
    %11 = vector.broadcast %10 : vector<8x1xf32> to vector<8x128xf32>
    %12 = arith.subf %8, %11 : vector<8x128xf32>
    %13 = math.exp %12 : vector<8x128xf32>
    %cst_9 = arith.constant dense<0.000000e+00> : vector<8xf32>
    %14 = vector.multi_reduction <add>, %13, %cst_9 [1] : vector<8x128xf32> to vector<8xf32>
    %15 = vector.shape_cast %14 : vector<8xf32> to vector<8x1xf32>
    %16 = math.log %15 : vector<8x1xf32>
    %17 = vector.broadcast %16 : vector<8x1xf32> to vector<8x128xf32>
    %18 = arith.subf %12, %17 : vector<8x128xf32>
    %c0_10 = arith.constant 0 : index
    %c0_11 = arith.constant 0 : index
    %19 = vector.load %arg5[%c0_10, %c0_11] : memref<8x128xf32, #tpu.memory_space<vmem>>, vector<8x128xf32>
    tpu.vector_store %arg5[%c0_10, %c0_11], %18 {strides = array<i32>} : memref<8x128xf32, #tpu.memory_space<vmem>>, vector<8x128xf32>,
    return
  }
  func.func @transform_0(%arg0: i32) -> (i32, i32) {
    %c0_i32 = arith.constant 0 : i32
    %c0_i32_0 = arith.constant 0 : i32
    return %arg0, %c0_i32 : i32, i32
  }
  func.func @transform_1(%arg0: i32) -> (i32, i32) {
    %c0_i32 = arith.constant 0 : i32
    %c0_i32_0 = arith.constant 0 : i32
    %c0_i32_1 = arith.constant 0 : i32
    return %c0_i32, %c0_i32_0 : i32, i32
  }
  func.func @transform_2(%arg0: i32) -> (i32, i32) {
    %c0_i32 = arith.constant 0 : i32
    %c0_i32_0 = arith.constant 0 : i32
    %c0_i32_1 = arith.constant 0 : i32
    return %c0_i32, %c0_i32_0 : i32, i32
  }
  func.func @transform_3(%arg0: i32) -> (i32, i32) {
    %c0_i32 = arith.constant 0 : i32
    %c0_i32_0 = arith.constant 0 : i32
    %c0_i32_1 = arith.constant 0 : i32
    return %c0_i32, %c0_i32_0 : i32, i32
  }
  func.func @transform_4(%arg0: i32) -> (i32, i32) {
    %c0_i32 = arith.constant 0 : i32
    %c0_i32_0 = arith.constant 0 : i32
    return %arg0, %c0_i32 : i32, i32
  }
}

</mosaic_0001>

<bundles_post_ra>
// kernel: tpu_custom_call.1
= control target key start
LH: loop header
LB: loop body
LE: loop exit
PB: predicated region body
PF: predicated region fallthrough
CT: control target
= control target key end

     0   :  { %v306_v1 = vmov 0.0   ;;  %vm307_vm0 = vmmov 0   ;;  %s391_s0 = inlined_call_operand.vmem [shape: f32[8,96], index: 0, kind: input, shape index: {}]   ;;  %s392_s1 = inlined_call_operand.vmem [shape: f32[96,32], index: 1, kind: input, shape index: {}]   ;;  %s393_s2 = inlined_call_operand.vmem [shape: f32[32,128], index: 2, kind: input, shape index: {}]   ;;  %s394_s3 = inlined_call_operand.vmem [shape: f32[1,128], index: 3, kind: input, shape index: {}]   ;;  %s395_s4 = inlined_call_operand.hbm [shape: f32[8,128], index: 4, kind: output, shape index: {}]  }
   0x1   :  { %v30_v0 = vld [vmem:[%s392_s1 + $0x58] sm:$0xff]  ;;  %237 = vmatprep.subr.mxu0 %v306_v1  ;;  %v29_v2 = vld [vmem:[%s392_s1 + $0x50] sm:$0xff]  ;;  %261 = vmatprep.mubr.msk.f32.mxu0 %vm307_vm0, %v306_v1  ;;  %v28_v3 = vld [vmem:[%s392_s1 + $0x48] sm:$0xff] }
   0x2   :  { %238 = vmatpush3.msra.mxu0 %v30_v0  ;;  %264 = vmatprep.subr.mxu1 %v306_v1 }
   0x3   :  { %239 = vmatprep.subr.mxu0 %v306_v1  ;;  %272 = vmatprep.mubr.msk.f32.mxu1 %vm307_vm0, %v306_v1 }
   0x4   :  { %240 = vmatpush3.msra.mxu0 %v29_v2 }
   0x5   :  { %9 = vsyncpa [#allocation3], 0  ;;  %241 = vmatprep.subr.mxu0 %v306_v1  ;;  %v27_v4 = vld [vmem:[%s392_s1 + $0x40] sm:$0xff]  ;;  %v26_v5 = vld [vmem:[%s392_s1 + $0x38] sm:$0xff]  ;;  %vm31_vm1 = vcmask 785408   ;;  %vm117_vm2 = vcmask 261120  }
   0x6   :  { %242 = vmatpush3.msra.mxu0 %v28_v3  ;;  %v25_v6 = vld [vmem:[%s392_s1 + $0x30] sm:$0xff]  ;;  %v24_v7 = vld [vmem:[%s392_s1 + $0x28] sm:$0xff]  ;;  %v23_v8 = vld [vmem:[%s392_s1 + $0x20] sm:$0xff] }
   0x7   :  { %243 = vmatprep.subr.mxu0 %v306_v1  ;;  %v22_v9 = vld [vmem:[%s392_s1 + $0x18] sm:$0xff]  ;;  %v21_v10 = vld [vmem:[%s392_s1 + $0x10] sm:$0xff]  ;;  %v20_v11 = vld [vmem:[%s392_s1 + $0x8] sm:$0xff] }
   0x8   :  { %244 = vmatpush3.msra.mxu0 %v27_v4  ;;  %v19_v12 = vld [vmem:[%s392_s1] sm:$0xff]  ;;  %v109_v14 = vld [vmem:[%s393_s2 + $0x18] sm:$0xff]  ;;  %v108_v15 = vld [vmem:[%s393_s2 + $0x10] sm:$0xff] }
   0x9   :  { %245 = vmatprep.subr.mxu0 %v306_v1  ;;  %v18_v13 = vld [vmem:[%s391_s0] sm:$0xff]  ;;  %265 = vmatpush3.msra.mxu1 %v109_v14  ;;  %v107_v16 = vld [vmem:[%s393_s2 + $0x8] sm:$0xff] }
   0xa   :  { %246 = vmatpush3.msra.mxu0 %v26_v5  ;;  %266 = vmatprep.subr.mxu1 %v306_v1  ;;  %v106_v17 = vld [vmem:[%s393_s2] sm:$0xff]  ;;  %s308_s2 = smov [#allocation2]  }
   0xb   :  { %247 = vmatprep.subr.mxu0 %v306_v1  ;;  %267 = vmatpush3.msra.mxu1 %v108_v15  ;;  %v217_v21 = vld [vmem:[%s394_s3] ss:$0 sm:$0xff]  ;;  %s208_s23 = sshll.u32 %s308_s2, 4  ;;  %s209_s23 = int_to_ptr.vmem [resolvable:$true] %s208_s23 }
   0xc   :  { %248 = vmatpush3.msra.mxu0 %v25_v6  ;;  %268 = vmatprep.subr.mxu1 %v306_v1  ;;  %s284_s3 = scalar_lea.vmem %s209_s23, 128  ;;  %p289_p1 = scmp.lt.s32.totalorder %s209_s23, %s209_s23 }
   0xd   :  { %249 = vmatprep.subr.mxu0 %v306_v1  ;;  %269 = vmatpush3.msra.mxu1 %v107_v16  ;;  %p285_p0 = scmp.ne.s32.totalorder %s209_s23, %s284_s3  ;;  %p290_p2 = scmp.lt.s32.totalorder %s284_s3, %s284_s3 }
   0xe   :  { %250 = vmatpush3.msra.mxu0 %v24_v7  ;;  %270 = vmatprep.subr.mxu1 %v306_v1 }
   0xf   :  { %251 = vmatprep.subr.mxu0 %v306_v1  ;;  %271 = vmatpush3.msra.mxu1 %v106_v17  ;;  %p291_p3 = por %p290_p2, %p289_p1 }
  0x10   :  { %252 = vmatpush3.msra.mxu0 %v23_v8 }
  0x11   :  { %253 = vmatprep.subr.mxu0 %v306_v1  ;;  %p292_p4 = pnand %p291_p3, %p285_p0 }
  0x12   :  { %254 = vmatpush3.msra.mxu0 %v22_v9 }
  0x13   :  { %255 = vmatprep.subr.mxu0 %v306_v1 }
  0x14   :  { %256 = vmatpush3.msra.mxu0 %v21_v10 }
  0x15   :  { %257 = vmatprep.subr.mxu0 %v306_v1 }
  0x16   :  { %258 = vmatpush3.msra.mxu0 %v20_v11 }
  0x17   :  { %259 = vmatprep.subr.mxu0 %v306_v1 }
  0x18   :  { %260 = vmatpush3.msra.mxu0 %v19_v12 }
  0x19   :  { %262 = vmatmul.mubr.msk.f32.vlgmr.msra.gmra.mxu0 %vm31_vm1, %v18_v13 }
  0xd9   :  { %v101_v18 = vpop.f32.mrf.mxu0 }
  0xda   :  { %278 = vtanh.f32 %v101_v18 }
  0xdb   :  { %v263_v19 = vpop.f32.mrf.mxu0 }
  0xe7   :  { %v279_v20 = vpop.eup %278 }
  0xe8   :  { %273 = vmatmul.mubr.msk.f32.vlgmr.msra.gmra.mxu1 %vm117_vm2, %v279_v20 }
 0x1a8   :  { %v187_v22 = vpop.f32.mrf.mxu1 }
 0x1a9   :  { %v188_v23 = vadd.f32 %v217_v21, %v187_v22 }
 0x1aa   :  { %v274_v24 = vpop.f32.mrf.mxu1 }
 0x1ab   :  { %191 = vmax.xlane.f32.xlu0 %v188_v23 }
 0x234   :  { %v192_v25 = vpop.xlane.xlu0 %191 }
 0x235   :  { %v193_v26 = vsub.f32 %v188_v23, %v192_v25 }
 0x237   :  { %v194_v27 = vmul.f32 1.442695, %v193_v26 }
 0x239   :  { %280 = vpow2.f32 %v194_v27 }
 0x246   :  { %v281_v28 = vpop.eup %280 }
 0x247   :  { %196 = vadd.xlane.f32.xlu0 %v281_v28 }
 0x2d0   :  { %v197_v29 = vpop.xlane.xlu0 %196 }
 0x2d1   :  { %282 = vlog2.f32 %v197_v29 }
 0x2de   :  { %v283_v30 = vpop.eup %282 }
 0x2df   :  { %v199_v31 = vmul.f32 0.6931472, %v283_v30 }
 0x2e1   :  { %v200_v32 = vsub.f32 %v193_v26, %v199_v31 }
 0x2e3   :  { %201 = vst [vmem:[#allocation2] sm:$0xff] %v200_v32 }
 0x2e4   :  { %295 = shalt.err (!%p292_p4)
}
 0x2e5   :  { %211 = dma.vmem_to_hbm [thread:$0]  %s209_s23, 128, %s395_s4, [#allocation3]  }
 0x2e6   :  { %304 = dma.done.wait [#allocation3], 128  }
 0x2e7   :  { %305 = vsyncadd [#allocation3], 4294967168 }
 0x2e8   :  { %215 = vsyncpa [#allocation3], 1 }

</bundles_post_ra>
